<compile_context>
chip_gen: v7x
topology: tpu7x:2x2x1
jax: 0.10.0
libtpu: 0.0.40
codegen_flags: <defaults>
</compile_context>

<pallas_src>
import math
import numpy as np
import jax
import jax.numpy as jnp
from jax.experimental import pallas as pl
from jax.experimental.pallas import tpu as pltpu

# ---- configuration (consistent with the module's constructor) ----
B = 8                # batch for the small demo
IN_OUT_DIM = 64      # in_out_dim
MID_DIM = 32         # mid_dim
HIDDEN = 1           # hidden layers in each coupling MLP
N_LAYERS = 4         # n_layers (coupling layers)
COMPRESS = 2         # bottleneck_factor ('redundancy' bottleneck)
EPS = 1e-5
LOG256 = math.log(256.0)
LOG_SQRT_2PI = 0.5 * math.log(2.0 * math.pi)
OUT_LANES = 128      # lane-dense output slab width

assert COMPRESS == 2  # the (a-b)^2/2 unbiased-variance identity below needs 2
assert HIDDEN >= 1


def nice_kernel(x_ref, w1_ref, b1_ref, wh_ref, bh_ref, w2_ref, b2_ref,
                smul_ref, diff_ref, ldj_ref, out_ref):
    mdt = w1_ref.dtype                                # matmul dtype (bf16 or f32)
    x = x_ref[...]                                    # (bb, D) f32

    # ---- f: additive coupling layers (masks pre-folded into the weights:
    # w1' = mask[:,None]*w1, w2' = w2*(1-mask)[None,:], b2' = b2*(1-mask)) ----
    for l in range(N_LAYERS):
        t = jnp.dot(x.astype(mdt), w1_ref[l],
                    preferred_element_type=jnp.float32) + b1_ref[l]
        t = jnp.maximum(t, 0.1 * t)                   # LeakyReLU(0.1)
        for h in range(HIDDEN):
            idx = l * HIDDEN + h
            t = jnp.dot(t.astype(mdt), wh_ref[idx],
                        preferred_element_type=jnp.float32) + bh_ref[idx]
            t = jnp.maximum(t, 0.1 * t)
        # y1 + y2 = x + m(mask*x) * (1 - mask)
        x = x + jnp.dot(t.astype(mdt), w2_ref[l],
                        preferred_element_type=jnp.float32) + b2_ref[l]

    # ---- bottleneck loss: unbiased variance across the COMPRESS=2
    # interleaved slices: var({a,b}, ddof=1) = (a-b)^2 / 2.  The scaling
    # smul and the 1/sqrt(2) are folded into diff at prep time, so the
    # (exact, f32) +/-1-style matmul consumes x directly. ----
    d = jnp.dot(x, diff_ref[...], preferred_element_type=jnp.float32)  # (bb, D//2)
    bn = jnp.sum(d * d, axis=1, keepdims=True)

    # ---- prior log-likelihood (gaussian) + log|det J|.  smul_s is
    # (exp(scale)+eps)/sqrt(2); ldj folds sum(scale) - D*log256
    # - D*log(sqrt(2*pi)) and arrives as an SMEM scalar. ----
    z = x * smul_ref[0]
    ll = ldj_ref[0, 0] - jnp.sum(z * z, axis=1, keepdims=True)

    # ---- single lane-dense output slab: lane 0 = ll+ldj, lane 1 = bn ----
    lane = jax.lax.broadcasted_iota(jnp.int32, out_ref.shape, 1)
    out_ref[...] = jnp.where(lane == 0, ll, jnp.where(lane == 1, bn, 0.0))


def _choose_block_b(b_total, preferred=2048):
    """Largest block that divides the batch, is a multiple of 8, is <= the
    preferred cap, and (when the batch permits) leaves >=2 grid steps so the
    'parallel' batch axis megacore-shards on v7x."""
    if b_total % 8 != 0:
        return b_total            # single full-extent block (still legal)
    cap = min(preferred, b_total)
    if b_total >= 16:
        cap = min(cap, b_total // 2)
    cap = max(8, (cap // 8) * 8)
    for bb in range(cap, 7, -8):
        if b_total % bb == 0:
            return bb
    return b_total


def nice_forward(x, kparams, *, block_b=None):
    """Runs the NICE forward pass. The batch is tiled over a 'parallel' grid
    in a single pallas_call (amortizes launch cost, megacore-shards on v7x);
    weights use constant index maps so they are DMA'd once."""
    w1, b1, wh, bh, w2, b2, smul, diff, ldj = kparams
    b_total, d = x.shape
    if block_b is None:
        block_b = _choose_block_b(b_total)
    assert b_total % block_b == 0
    assert block_b % 8 == 0 or block_b == b_total
    grid = (b_total // block_b,)

    def const_spec(a):
        zeros = (0,) * a.ndim
        return pl.BlockSpec(a.shape, lambda i, _z=zeros: _z)

    out = pl.pallas_call(
        nice_kernel,
        grid=grid,
        out_shape=jax.ShapeDtypeStruct((b_total, OUT_LANES), jnp.float32),
        in_specs=[
            pl.BlockSpec((block_b, d), lambda i: (i, 0)),        # x
            const_spec(w1), const_spec(b1),                       # weights: DMA'd once
            const_spec(wh), const_spec(bh),
            const_spec(w2), const_spec(b2),
            const_spec(smul), const_spec(diff),
            pl.BlockSpec(memory_space=pltpu.MemorySpace.SMEM),    # folded ldj scalar
        ],
        out_specs=pl.BlockSpec((block_b, OUT_LANES), lambda i: (i, 0)),
        compiler_params=pltpu.CompilerParams(
            dimension_semantics=("parallel",)),
    )(x, w1, b1, wh, bh, w2, b2, smul, diff, ldj)
    return out[:, 0], out[:, 1]


# ---- deterministic parameter construction (PyTorch-Linear-style init) ----
def _linear_init(key, fan_in, fan_out):
    kw, kb = jax.random.split(key)
    bound = 1.0 / math.sqrt(fan_in)
    w = jax.random.uniform(kw, (fan_in, fan_out), jnp.float32, -bound, bound)
    b = jax.random.uniform(kb, (fan_out,), jnp.float32, -bound, bound)
    return w, b


def init_raw_params(key):
    # masks: mask_config = layer % 2 ;  mask[::2] = 1 - mask_config
    masks = np.zeros((N_LAYERS, IN_OUT_DIM), np.float32)
    for i in range(N_LAYERS):
        mc = i % 2
        masks[i, :] = float(mc)
        masks[i, ::2] = float(1 - mc)

    keys = iter(jax.random.split(key, N_LAYERS * (2 + HIDDEN)))
    w1s, b1s, whs, bhs, w2s, b2s = [], [], [], [], [], []
    for _ in range(N_LAYERS):
        w, b = _linear_init(next(keys), IN_OUT_DIM, MID_DIM)
        w1s.append(w); b1s.append(b)
        wh_l, bh_l = [], []
        for _ in range(HIDDEN):
            w, b = _linear_init(next(keys), MID_DIM, MID_DIM)
            wh_l.append(w); bh_l.append(b)
        whs.append(jnp.stack(wh_l)); bhs.append(jnp.stack(bh_l))
        w, b = _linear_init(next(keys), MID_DIM, IN_OUT_DIM)
        w2s.append(w); b2s.append(b)

    scale = jnp.zeros((1, IN_OUT_DIM), jnp.float32)   # Scaling.scale init = zeros

    return (jnp.asarray(masks), jnp.stack(w1s), jnp.stack(b1s),
            jnp.stack(whs), jnp.stack(bhs), jnp.stack(w2s), jnp.stack(b2s),
            scale)


def prepare_kernel_params(raw, matmul_dtype=jnp.bfloat16):
    """One-time parameter transform (not per-call): fold the 0/1 masks into
    the coupling weights (optionally casting them to bf16 for single-pass MXU
    matmuls with f32 accumulation), precompute (exp(scale)+eps)/sqrt(2), fold
    all batch-independent constants into one log-det scalar, and fold smul and
    the 1/2 into the +/-1 pairwise-difference matrix for the bottleneck."""
    mask, w1, b1, wh, bh, w2, b2, scale = raw
    w1f = (mask[:, :, None] * w1).astype(matmul_dtype)        # (L, D, M)
    w2f = (w2 * (1.0 - mask)[:, None, :]).astype(matmul_dtype)  # (L, M, D)
    b2f = (b2 * (1.0 - mask)).astype(jnp.float32)             # (L, D)
    whf = wh.reshape(N_LAYERS * HIDDEN, MID_DIM, MID_DIM).astype(matmul_dtype)
    bhf = bh.reshape(N_LAYERS * HIDDEN, MID_DIM).astype(jnp.float32)
    b1f = b1.astype(jnp.float32)

    smul = jnp.exp(scale) + EPS                               # (1, D)
    smul_s = (smul / math.sqrt(2.0)).astype(jnp.float32)      # folds the 0.5 in z^2

    ldj = (jnp.sum(scale) - (LOG256 + LOG_SQRT_2PI) * IN_OUT_DIM)
    ldj = ldj.reshape(1, 1).astype(jnp.float32)

    diff = np.zeros((IN_OUT_DIM, IN_OUT_DIM // COMPRESS), np.float32)
    for j in range(IN_OUT_DIM // COMPRESS):
        diff[COMPRESS * j, j] = 1.0
        diff[COMPRESS * j + 1, j] = -1.0
    diff = (jnp.asarray(diff) * smul[0][:, None] / math.sqrt(2.0)).astype(jnp.float32)

    return (w1f, b1f, whf, bhf, w2f, b2f, smul_s, diff, ldj)


# ---- pure-JAX reference (mirrors the PyTorch forward exactly; optional
# matmul_dtype applies the same bf16-input / f32-accumulate scheme as the
# kernel's perf path so it can be validated tightly) ----
def nice_ref(x, raw, matmul_dtype=None):
    mask, w1, b1, wh, bh, w2, b2, scale = raw

    def mm(a, w):
        if matmul_dtype is None:
            return a @ w
        return jnp.dot(a.astype(matmul_dtype), w.astype(matmul_dtype),
                       preferred_element_type=jnp.float32)

    for l in range(N_LAYERS):
        x1 = mask[l] * x
        t = mm(x1, w1[l]) + b1[l]
        t = jnp.where(t > 0, t, 0.1 * t)
        for h in range(HIDDEN):
            t = mm(t, wh[l, h]) + bh[l, h]
            t = jnp.where(t > 0, t, 0.1 * t)
        x = x + (mm(t, w2[l]) + b2[l]) * (1.0 - mask[l])
    z = x * (jnp.exp(scale[0]) + EPS)
    log_det_J = jnp.sum(scale) - LOG256 * IN_OUT_DIM
    slices = [z[:, i::COMPRESS] for i in range(COMPRESS)]
    s = jnp.stack(slices, axis=1)                      # (B, compress, D//c)
    bn = jnp.sum(jnp.var(s, axis=1, ddof=1), axis=1)
    log_ll = 0.0
    for sl in slices:
        log_ll = log_ll + jnp.sum(-0.5 * sl * sl - LOG_SQRT_2PI, axis=1)
    return log_ll + log_det_J, bn


# TODO(synk): only the configured forward path (additive coupling, gaussian
# prior, 'redundancy' bottleneck) is implemented; reverse/sampling and the
# affine/'logistic'/'null' branches of the module are not ported.

if __name__ == "__main__":
    key = jax.random.PRNGKey(0)
    kx, kp, kb = jax.random.split(key, 3)
    raw = init_raw_params(kp)

    # ---- exact f32-matmul path: tight check against the PyTorch-mirroring
    # reference at the small module-consistent shape ----
    kparams_f32 = prepare_kernel_params(raw, matmul_dtype=jnp.float32)
    x = jax.random.normal(kx, (B, IN_OUT_DIM), jnp.float32)
    ll, bn = nice_forward(x, kparams_f32)
    jax.block_until_ready((ll, bn))
    ll_r, bn_r = nice_ref(x, raw)
    np.testing.assert_allclose(np.asarray(ll), np.asarray(ll_r), rtol=1e-4, atol=1e-3)
    np.testing.assert_allclose(np.asarray(bn), np.asarray(bn_r), rtol=1e-4, atol=1e-3)

    # ---- default perf path (bf16 matmuls, f32 accumulate) on a larger batch:
    # >=2 'parallel' grid steps (megacore on v7x), checked against a reference
    # that applies the same matmul dtype ----
    kparams = prepare_kernel_params(raw)               # bf16 by default
    x_big = jax.random.normal(kb, (512, IN_OUT_DIM), jnp.float32)
    ll_b, bn_b = nice_forward(x_big, kparams)
    jax.block_until_ready((ll_b, bn_b))
    ll_br, bn_br = nice_ref(x_big, raw, matmul_dtype=jnp.bfloat16)
    np.testing.assert_allclose(np.asarray(ll_b), np.asarray(ll_br), rtol=1e-3, atol=3e-2)
    np.testing.assert_allclose(np.asarray(bn_b), np.asarray(bn_br), rtol=1e-3, atol=3e-2)

    print("KERNEL_OK")
</pallas_src>

<mosaic_0001>
module attributes {stable_mosaic.version = 11 : i64} {
  func.func @nice_kernel(%arg0: i32, %arg1: memref<8x64xf32, #tpu.memory_space<vmem>>, %arg2: memref<4x64x32xf32, #tpu.memory_space<vmem>>, %arg3: memref<4x32xf32, #tpu.memory_space<vmem>>, %arg4: memref<4x32x32xf32, #tpu.memory_space<vmem>>, %arg5: memref<4x32xf32, #tpu.memory_space<vmem>>, %arg6: memref<4x32x64xf32, #tpu.memory_space<vmem>>, %arg7: memref<4x64xf32, #tpu.memory_space<vmem>>, %arg8: memref<1x64xf32, #tpu.memory_space<vmem>>, %arg9: memref<64x32xf32, #tpu.memory_space<vmem>>, %arg10: memref<1x1xf32, #tpu.memory_space<smem>>, %arg11: memref<8x128xf32, #tpu.memory_space<vmem>>) attributes {dimension_semantics = [#tpu.dimension_semantics<parallel>], iteration_bounds = array<i64: 1>, scalar_prefetch = 0 : i64, scratch_operands = 0 : i64, tpu.core_type = #tpu.core_type<tc>, window_params = [{transform_indices = @transform_0, window_bounds = array<i64: 8, 64>}, {pipeline_mode = #tpu.pipeline_mode<synchronous>, transform_indices = @transform_1, window_bounds = array<i64: 4, 64, 32>}, {pipeline_mode = #tpu.pipeline_mode<synchronous>, transform_indices = @transform_2, window_bounds = array<i64: 4, 32>}, {pipeline_mode = #tpu.pipeline_mode<synchronous>, transform_indices = @transform_3, window_bounds = array<i64: 4, 32, 32>}, {pipeline_mode = #tpu.pipeline_mode<synchronous>, transform_indices = @transform_4, window_bounds = array<i64: 4, 32>}, {pipeline_mode = #tpu.pipeline_mode<synchronous>, transform_indices = @transform_5, window_bounds = array<i64: 4, 32, 64>}, {pipeline_mode = #tpu.pipeline_mode<synchronous>, transform_indices = @transform_6, window_bounds = array<i64: 4, 64>}, {pipeline_mode = #tpu.pipeline_mode<synchronous>, transform_indices = @transform_7, window_bounds = array<i64: 1, 64>}, {pipeline_mode = #tpu.pipeline_mode<synchronous>, transform_indices = @transform_8, window_bounds = array<i64: 64, 32>}, {transform_indices = @transform_9, window_bounds = array<i64: 1, 1>}, {transform_indices = @transform_10, window_bounds = array<i64: 8, 128>}]} {
    %c0 = arith.constant 0 : index
    %c0_0 = arith.constant 0 : index
    %0 = vector.load %arg1[%c0, %c0_0] : memref<8x64xf32, #tpu.memory_space<vmem>>, vector<8x64xf32>
    %c0_1 = arith.constant 0 : index
    %c0_2 = arith.constant 0 : index
    %c0_3 = arith.constant 0 : index
    %1 = vector.load %arg2[%c0_1, %c0_2, %c0_3] : memref<4x64x32xf32, #tpu.memory_space<vmem>>, vector<1x64x32xf32>
    %2 = vector.shape_cast %1 : vector<1x64x32xf32> to vector<64x32xf32>
    %cst = arith.constant dense<0.000000e+00> : vector<8x32xf32>
    %3 = tpu.matmul %0, %2, %cst {dimension_numbers = #tpu.dot_dimension_numbers<[1], [0], [0], [1], [0, 0, 1, 1], [], []>} : vector<8x64xf32>, vector<64x32xf32>, vector<8x32xf32> -> vector<8x32xf32>
    %c0_4 = arith.constant 0 : index
    %c0_5 = arith.constant 0 : index
    %4 = vector.load %arg3[%c0_4, %c0_5] : memref<4x32xf32, #tpu.memory_space<vmem>>, vector<1x32xf32>
    %5 = vector.shape_cast %4 : vector<1x32xf32> to vector<32xf32>
    %6 = vector.shape_cast %5 : vector<32xf32> to vector<1x32xf32>
    %7 = vector.broadcast %6 : vector<1x32xf32> to vector<8x32xf32>
    %8 = arith.addf %3, %7 : vector<8x32xf32>
    %cst_6 = arith.constant 1.000000e-01 : f32
    %9 = vector.broadcast %cst_6 : f32 to vector<8x32xf32>
    %10 = arith.mulf %9, %8 : vector<8x32xf32>
    %11 = arith.maximumf %8, %10 : vector<8x32xf32>
    %c0_7 = arith.constant 0 : index
    %c0_8 = arith.constant 0 : index
    %c0_9 = arith.constant 0 : index
    %12 = vector.load %arg4[%c0_7, %c0_8, %c0_9] : memref<4x32x32xf32, #tpu.memory_space<vmem>>, vector<1x32x32xf32>
    %13 = vector.shape_cast %12 : vector<1x32x32xf32> to vector<32x32xf32>
    %cst_10 = arith.constant dense<0.000000e+00> : vector<8x32xf32>
    %14 = tpu.matmul %11, %13, %cst_10 {dimension_numbers = #tpu.dot_dimension_numbers<[1], [0], [0], [1], [0, 0, 1, 1], [], []>} : vector<8x32xf32>, vector<32x32xf32>, vector<8x32xf32> -> vector<8x32xf32>
    %c0_11 = arith.constant 0 : index
    %c0_12 = arith.constant 0 : index
    %15 = vector.load %arg5[%c0_11, %c0_12] : memref<4x32xf32, #tpu.memory_space<vmem>>, vector<1x32xf32>
    %16 = vector.shape_cast %15 : vector<1x32xf32> to vector<32xf32>
    %17 = vector.shape_cast %16 : vector<32xf32> to vector<1x32xf32>
    %18 = vector.broadcast %17 : vector<1x32xf32> to vector<8x32xf32>
    %19 = arith.addf %14, %18 : vector<8x32xf32>
    %cst_13 = arith.constant 1.000000e-01 : f32
    %20 = vector.broadcast %cst_13 : f32 to vector<8x32xf32>
    %21 = arith.mulf %20, %19 : vector<8x32xf32>
    %22 = arith.maximumf %19, %21 : vector<8x32xf32>
    %c0_14 = arith.constant 0 : index
    %c0_15 = arith.constant 0 : index
    %c0_16 = arith.constant 0 : index
    %23 = vector.load %arg6[%c0_14, %c0_15, %c0_16] : memref<4x32x64xf32, #tpu.memory_space<vmem>>, vector<1x32x64xf32>
    %24 = vector.shape_cast %23 : vector<1x32x64xf32> to vector<32x64xf32>
    %cst_17 = arith.constant dense<0.000000e+00> : vector<8x64xf32>
    %25 = tpu.matmul %22, %24, %cst_17 {dimension_numbers = #tpu.dot_dimension_numbers<[1], [0], [0], [1], [0, 0, 1, 1], [], []>} : vector<8x32xf32>, vector<32x64xf32>, vector<8x64xf32> -> vector<8x64xf32>
    %26 = arith.addf %0, %25 : vector<8x64xf32>
    %c0_18 = arith.constant 0 : index
    %c0_19 = arith.constant 0 : index
    %27 = vector.load %arg7[%c0_18, %c0_19] : memref<4x64xf32, #tpu.memory_space<vmem>>, vector<1x64xf32>
    %28 = vector.shape_cast %27 : vector<1x64xf32> to vector<64xf32>
    %29 = vector.shape_cast %28 : vector<64xf32> to vector<1x64xf32>
    %30 = vector.broadcast %29 : vector<1x64xf32> to vector<8x64xf32>
    %31 = arith.addf %26, %30 : vector<8x64xf32>
    %c1 = arith.constant 1 : index
    %c0_20 = arith.constant 0 : index
    %c0_21 = arith.constant 0 : index
    %32 = vector.load %arg2[%c1, %c0_20, %c0_21] : memref<4x64x32xf32, #tpu.memory_space<vmem>>, vector<1x64x32xf32>
    %33 = vector.shape_cast %32 : vector<1x64x32xf32> to vector<64x32xf32>
    %cst_22 = arith.constant dense<0.000000e+00> : vector<8x32xf32>
    %34 = tpu.matmul %31, %33, %cst_22 {dimension_numbers = #tpu.dot_dimension_numbers<[1], [0], [0], [1], [0, 0, 1, 1], [], []>} : vector<8x64xf32>, vector<64x32xf32>, vector<8x32xf32> -> vector<8x32xf32>
    %c1_23 = arith.constant 1 : index
    %c0_24 = arith.constant 0 : index
    %35 = vector.load %arg3[%c1_23, %c0_24] : memref<4x32xf32, #tpu.memory_space<vmem>>, vector<1x32xf32>
    %36 = vector.shape_cast %35 : vector<1x32xf32> to vector<32xf32>
    %37 = vector.shape_cast %36 : vector<32xf32> to vector<1x32xf32>
    %38 = vector.broadcast %37 : vector<1x32xf32> to vector<8x32xf32>
    %39 = arith.addf %34, %38 : vector<8x32xf32>
    %cst_25 = arith.constant 1.000000e-01 : f32
    %40 = vector.broadcast %cst_25 : f32 to vector<8x32xf32>
    %41 = arith.mulf %40, %39 : vector<8x32xf32>
    %42 = arith.maximumf %39, %41 : vector<8x32xf32>
    %c1_26 = arith.constant 1 : index
    %c0_27 = arith.constant 0 : index
    %c0_28 = arith.constant 0 : index
    %43 = vector.load %arg4[%c1_26, %c0_27, %c0_28] : memref<4x32x32xf32, #tpu.memory_space<vmem>>, vector<1x32x32xf32>
    %44 = vector.shape_cast %43 : vector<1x32x32xf32> to vector<32x32xf32>
    %cst_29 = arith.constant dense<0.000000e+00> : vector<8x32xf32>
    %45 = tpu.matmul %42, %44, %cst_29 {dimension_numbers = #tpu.dot_dimension_numbers<[1], [0], [0], [1], [0, 0, 1, 1], [], []>} : vector<8x32xf32>, vector<32x32xf32>, vector<8x32xf32> -> vector<8x32xf32>
    %c1_30 = arith.constant 1 : index
    %c0_31 = arith.constant 0 : index
    %46 = vector.load %arg5[%c1_30, %c0_31] : memref<4x32xf32, #tpu.memory_space<vmem>>, vector<1x32xf32>
    %47 = vector.shape_cast %46 : vector<1x32xf32> to vector<32xf32>
    %48 = vector.shape_cast %47 : vector<32xf32> to vector<1x32xf32>
    %49 = vector.broadcast %48 : vector<1x32xf32> to vector<8x32xf32>
    %50 = arith.addf %45, %49 : vector<8x32xf32>
    %cst_32 = arith.constant 1.000000e-01 : f32
    %51 = vector.broadcast %cst_32 : f32 to vector<8x32xf32>
    %52 = arith.mulf %51, %50 : vector<8x32xf32>
    %53 = arith.maximumf %50, %52 : vector<8x32xf32>
    %c1_33 = arith.constant 1 : index
    %c0_34 = arith.constant 0 : index
    %c0_35 = arith.constant 0 : index
    %54 = vector.load %arg6[%c1_33, %c0_34, %c0_35] : memref<4x32x64xf32, #tpu.memory_space<vmem>>, vector<1x32x64xf32>
    %55 = vector.shape_cast %54 : vector<1x32x64xf32> to vector<32x64xf32>
    %cst_36 = arith.constant dense<0.000000e+00> : vector<8x64xf32>
    %56 = tpu.matmul %53, %55, %cst_36 {dimension_numbers = #tpu.dot_dimension_numbers<[1], [0], [0], [1], [0, 0, 1, 1], [], []>} : vector<8x32xf32>, vector<32x64xf32>, vector<8x64xf32> -> vector<8x64xf32>
    %57 = arith.addf %31, %56 : vector<8x64xf32>
    %c1_37 = arith.constant 1 : index
    %c0_38 = arith.constant 0 : index
    %58 = vector.load %arg7[%c1_37, %c0_38] : memref<4x64xf32, #tpu.memory_space<vmem>>, vector<1x64xf32>
    %59 = vector.shape_cast %58 : vector<1x64xf32> to vector<64xf32>
    %60 = vector.shape_cast %59 : vector<64xf32> to vector<1x64xf32>
    %61 = vector.broadcast %60 : vector<1x64xf32> to vector<8x64xf32>
    %62 = arith.addf %57, %61 : vector<8x64xf32>
    %c2 = arith.constant 2 : index
    %c0_39 = arith.constant 0 : index
    %c0_40 = arith.constant 0 : index
    %63 = vector.load %arg2[%c2, %c0_39, %c0_40] : memref<4x64x32xf32, #tpu.memory_space<vmem>>, vector<1x64x32xf32>
    %64 = vector.shape_cast %63 : vector<1x64x32xf32> to vector<64x32xf32>
    %cst_41 = arith.constant dense<0.000000e+00> : vector<8x32xf32>
    %65 = tpu.matmul %62, %64, %cst_41 {dimension_numbers = #tpu.dot_dimension_numbers<[1], [0], [0], [1], [0, 0, 1, 1], [], []>} : vector<8x64xf32>, vector<64x32xf32>, vector<8x32xf32> -> vector<8x32xf32>
    %c2_42 = arith.constant 2 : index
    %c0_43 = arith.constant 0 : index
    %66 = vector.load %arg3[%c2_42, %c0_43] : memref<4x32xf32, #tpu.memory_space<vmem>>, vector<1x32xf32>
    %67 = vector.shape_cast %66 : vector<1x32xf32> to vector<32xf32>
    %68 = vector.shape_cast %67 : vector<32xf32> to vector<1x32xf32>
    %69 = vector.broadcast %68 : vector<1x32xf32> to vector<8x32xf32>
    %70 = arith.addf %65, %69 : vector<8x32xf32>
    %cst_44 = arith.constant 1.000000e-01 : f32
    %71 = vector.broadcast %cst_44 : f32 to vector<8x32xf32>
    %72 = arith.mulf %71, %70 : vector<8x32xf32>
    %73 = arith.maximumf %70, %72 : vector<8x32xf32>
    %c2_45 = arith.constant 2 : index
    %c0_46 = arith.constant 0 : index
    %c0_47 = arith.constant 0 : index
    %74 = vector.load %arg4[%c2_45, %c0_46, %c0_47] : memref<4x32x32xf32, #tpu.memory_space<vmem>>, vector<1x32x32xf32>
    %75 = vector.shape_cast %74 : vector<1x32x32xf32> to vector<32x32xf32>
    %cst_48 = arith.constant dense<0.000000e+00> : vector<8x32xf32>
    %76 = tpu.matmul %73, %75, %cst_48 {dimension_numbers = #tpu.dot_dimension_numbers<[1], [0], [0], [1], [0, 0, 1, 1], [], []>} : vector<8x32xf32>, vector<32x32xf32>, vector<8x32xf32> -> vector<8x32xf32>
    %c2_49 = arith.constant 2 : index
    %c0_50 = arith.constant 0 : index
    %77 = vector.load %arg5[%c2_49, %c0_50] : memref<4x32xf32, #tpu.memory_space<vmem>>, vector<1x32xf32>
    %78 = vector.shape_cast %77 : vector<1x32xf32> to vector<32xf32>
    %79 = vector.shape_cast %78 : vector<32xf32> to vector<1x32xf32>
    %80 = vector.broadcast %79 : vector<1x32xf32> to vector<8x32xf32>
    %81 = arith.addf %76, %80 : vector<8x32xf32>
    %cst_51 = arith.constant 1.000000e-01 : f32
    %82 = vector.broadcast %cst_51 : f32 to vector<8x32xf32>
    %83 = arith.mulf %82, %81 : vector<8x32xf32>
    %84 = arith.maximumf %81, %83 : vector<8x32xf32>
    %c2_52 = arith.constant 2 : index
    %c0_53 = arith.constant 0 : index
    %c0_54 = arith.constant 0 : index
    %85 = vector.load %arg6[%c2_52, %c0_53, %c0_54] : memref<4x32x64xf32, #tpu.memory_space<vmem>>, vector<1x32x64xf32>
    %86 = vector.shape_cast %85 : vector<1x32x64xf32> to vector<32x64xf32>
    %cst_55 = arith.constant dense<0.000000e+00> : vector<8x64xf32>
    %87 = tpu.matmul %84, %86, %cst_55 {dimension_numbers = #tpu.dot_dimension_numbers<[1], [0], [0], [1], [0, 0, 1, 1], [], []>} : vector<8x32xf32>, vector<32x64xf32>, vector<8x64xf32> -> vector<8x64xf32>
    %88 = arith.addf %62, %87 : vector<8x64xf32>
    %c2_56 = arith.constant 2 : index
    %c0_57 = arith.constant 0 : index
    %89 = vector.load %arg7[%c2_56, %c0_57] : memref<4x64xf32, #tpu.memory_space<vmem>>, vector<1x64xf32>
    %90 = vector.shape_cast %89 : vector<1x64xf32> to vector<64xf32>
    %91 = vector.shape_cast %90 : vector<64xf32> to vector<1x64xf32>
    %92 = vector.broadcast %91 : vector<1x64xf32> to vector<8x64xf32>
    %93 = arith.addf %88, %92 : vector<8x64xf32>
    %c3 = arith.constant 3 : index
    %c0_58 = arith.constant 0 : index
    %c0_59 = arith.constant 0 : index
    %94 = vector.load %arg2[%c3, %c0_58, %c0_59] : memref<4x64x32xf32, #tpu.memory_space<vmem>>, vector<1x64x32xf32>
    %95 = vector.shape_cast %94 : vector<1x64x32xf32> to vector<64x32xf32>
    %cst_60 = arith.constant dense<0.000000e+00> : vector<8x32xf32>
    %96 = tpu.matmul %93, %95, %cst_60 {dimension_numbers = #tpu.dot_dimension_numbers<[1], [0], [0], [1], [0, 0, 1, 1], [], []>} : vector<8x64xf32>, vector<64x32xf32>, vector<8x32xf32> -> vector<8x32xf32>
    %c3_61 = arith.constant 3 : index
    %c0_62 = arith.constant 0 : index
    %97 = vector.load %arg3[%c3_61, %c0_62] : memref<4x32xf32, #tpu.memory_space<vmem>>, vector<1x32xf32>
    %98 = vector.shape_cast %97 : vector<1x32xf32> to vector<32xf32>
    %99 = vector.shape_cast %98 : vector<32xf32> to vector<1x32xf32>
    %100 = vector.broadcast %99 : vector<1x32xf32> to vector<8x32xf32>
    %101 = arith.addf %96, %100 : vector<8x32xf32>
    %cst_63 = arith.constant 1.000000e-01 : f32
    %102 = vector.broadcast %cst_63 : f32 to vector<8x32xf32>
    %103 = arith.mulf %102, %101 : vector<8x32xf32>
    %104 = arith.maximumf %101, %103 : vector<8x32xf32>
    %c3_64 = arith.constant 3 : index
    %c0_65 = arith.constant 0 : index
    %c0_66 = arith.constant 0 : index
    %105 = vector.load %arg4[%c3_64, %c0_65, %c0_66] : memref<4x32x32xf32, #tpu.memory_space<vmem>>, vector<1x32x32xf32>
    %106 = vector.shape_cast %105 : vector<1x32x32xf32> to vector<32x32xf32>
    %cst_67 = arith.constant dense<0.000000e+00> : vector<8x32xf32>
    %107 = tpu.matmul %104, %106, %cst_67 {dimension_numbers = #tpu.dot_dimension_numbers<[1], [0], [0], [1], [0, 0, 1, 1], [], []>} : vector<8x32xf32>, vector<32x32xf32>, vector<8x32xf32> -> vector<8x32xf32>
    %c3_68 = arith.constant 3 : index
    %c0_69 = arith.constant 0 : index
    %108 = vector.load %arg5[%c3_68, %c0_69] : memref<4x32xf32, #tpu.memory_space<vmem>>, vector<1x32xf32>
    %109 = vector.shape_cast %108 : vector<1x32xf32> to vector<32xf32>
    %110 = vector.shape_cast %109 : vector<32xf32> to vector<1x32xf32>
    %111 = vector.broadcast %110 : vector<1x32xf32> to vector<8x32xf32>
    %112 = arith.addf %107, %111 : vector<8x32xf32>
    %cst_70 = arith.constant 1.000000e-01 : f32
    %113 = vector.broadcast %cst_70 : f32 to vector<8x32xf32>
    %114 = arith.mulf %113, %112 : vector<8x32xf32>
    %115 = arith.maximumf %112, %114 : vector<8x32xf32>
    %c3_71 = arith.constant 3 : index
    %c0_72 = arith.constant 0 : index
    %c0_73 = arith.constant 0 : index
    %116 = vector.load %arg6[%c3_71, %c0_72, %c0_73] : memref<4x32x64xf32, #tpu.memory_space<vmem>>, vector<1x32x64xf32>
    %117 = vector.shape_cast %116 : vector<1x32x64xf32> to vector<32x64xf32>
    %cst_74 = arith.constant dense<0.000000e+00> : vector<8x64xf32>
    %118 = tpu.matmul %115, %117, %cst_74 {dimension_numbers = #tpu.dot_dimension_numbers<[1], [0], [0], [1], [0, 0, 1, 1], [], []>} : vector<8x32xf32>, vector<32x64xf32>, vector<8x64xf32> -> vector<8x64xf32>
    %119 = arith.addf %93, %118 : vector<8x64xf32>
    %c3_75 = arith.constant 3 : index
    %c0_76 = arith.constant 0 : index
    %120 = vector.load %arg7[%c3_75, %c0_76] : memref<4x64xf32, #tpu.memory_space<vmem>>, vector<1x64xf32>
    %121 = vector.shape_cast %120 : vector<1x64xf32> to vector<64xf32>
    %122 = vector.shape_cast %121 : vector<64xf32> to vector<1x64xf32>
    %123 = vector.broadcast %122 : vector<1x64xf32> to vector<8x64xf32>
    %124 = arith.addf %119, %123 : vector<8x64xf32>
    %c0_77 = arith.constant 0 : index
    %c0_78 = arith.constant 0 : index
    %125 = vector.load %arg9[%c0_77, %c0_78] : memref<64x32xf32, #tpu.memory_space<vmem>>, vector<64x32xf32>
    %cst_79 = arith.constant dense<0.000000e+00> : vector<8x32xf32>
    %126 = tpu.matmul %124, %125, %cst_79 {dimension_numbers = #tpu.dot_dimension_numbers<[1], [0], [0], [1], [0, 0, 1, 1], [], []>} : vector<8x64xf32>, vector<64x32xf32>, vector<8x32xf32> -> vector<8x32xf32>
    %127 = arith.mulf %126, %126 : vector<8x32xf32>
    %cst_80 = arith.constant dense<0.000000e+00> : vector<8xf32>
    %128 = vector.multi_reduction <add>, %127, %cst_80 [1] : vector<8x32xf32> to vector<8xf32>
    %129 = vector.shape_cast %128 : vector<8xf32> to vector<8x1xf32>
    %c0_81 = arith.constant 0 : index
    %c0_82 = arith.constant 0 : index
    %130 = vector.load %arg8[%c0_81, %c0_82] : memref<1x64xf32, #tpu.memory_space<vmem>>, vector<1x64xf32>
    %131 = vector.shape_cast %130 : vector<1x64xf32> to vector<64xf32>
    %132 = vector.shape_cast %131 : vector<64xf32> to vector<1x64xf32>
    %133 = vector.broadcast %132 : vector<1x64xf32> to vector<8x64xf32>
    %134 = arith.mulf %124, %133 : vector<8x64xf32>
    %c0_83 = arith.constant 0 : index
    %c0_84 = arith.constant 0 : index
    %135 = memref.load %arg10[%c0_83, %c0_84] : memref<1x1xf32, #tpu.memory_space<smem>>
    %136 = arith.mulf %134, %134 : vector<8x64xf32>
    %cst_85 = arith.constant dense<0.000000e+00> : vector<8xf32>
    %137 = vector.multi_reduction <add>, %136, %cst_85 [1] : vector<8x64xf32> to vector<8xf32>
    %138 = vector.shape_cast %137 : vector<8xf32> to vector<8x1xf32>
    %139 = vector.broadcast %135 : f32 to vector<8x1xf32>
    %140 = arith.subf %139, %138 : vector<8x1xf32>
    %141 = tpu.iota {dimensions = array<i32: 1>} : vector<8x128xi32>
    %c0_i32 = arith.constant 0 : i32
    %142 = vector.broadcast %c0_i32 : i32 to vector<8x128xi32>
    %143 = arith.cmpi eq, %141, %142 : vector<8x128xi32>
    %c1_i32 = arith.constant 1 : i32
    %144 = vector.broadcast %c1_i32 : i32 to vector<8x128xi32>
    %145 = arith.cmpi eq, %141, %144 : vector<8x128xi32>
    %cst_86 = arith.constant 0.000000e+00 : f32
    %146 = vector.shape_cast %129 : vector<8x1xf32> to vector<8x1xf32>
    %147 = vector.broadcast %146 : vector<8x1xf32> to vector<8x128xf32>
    %148 = vector.broadcast %cst_86 : f32 to vector<8x128xf32>
    %149 = arith.select %145, %147, %148 : vector<8x128xi1>, vector<8x128xf32>
    %150 = vector.shape_cast %140 : vector<8x1xf32> to vector<8x1xf32>
    %151 = vector.broadcast %150 : vector<8x1xf32> to vector<8x128xf32>
    %152 = arith.select %143, %151, %149 : vector<8x128xi1>, vector<8x128xf32>
    %c0_87 = arith.constant 0 : index
    %c0_88 = arith.constant 0 : index
    %153 = vector.load %arg11[%c0_87, %c0_88] : memref<8x128xf32, #tpu.memory_space<vmem>>, vector<8x128xf32>
    tpu.vector_store %arg11[%c0_87, %c0_88], %152 {strides = array<i32>} : memref<8x128xf32, #tpu.memory_space<vmem>>, vector<8x128xf32>,
    return
  }
  func.func @transform_0(%arg0: i32) -> (i32, i32) {
    %c0_i32 = arith.constant 0 : i32
    %c0_i32_0 = arith.constant 0 : i32
    return %arg0, %c0_i32 : i32, i32
  }
  func.func @transform_1(%arg0: i32) -> (i32, i32, i32) {
    %c0_i32 = arith.constant 0 : i32
    %c0_i32_0 = arith.constant 0 : i32
    %c0_i32_1 = arith.constant 0 : i32
    %c0_i32_2 = arith.constant 0 : i32
    return %c0_i32, %c0_i32_0, %c0_i32_1 : i32, i32, i32
  }
  func.func @transform_2(%arg0: i32) -> (i32, i32) {
    %c0_i32 = arith.constant 0 : i32
    %c0_i32_0 = arith.constant 0 : i32
    %c0_i32_1 = arith.constant 0 : i32
    return %c0_i32, %c0_i32_0 : i32, i32
  }
  func.func @transform_3(%arg0: i32) -> (i32, i32, i32) {
    %c0_i32 = arith.constant 0 : i32
    %c0_i32_0 = arith.constant 0 : i32
    %c0_i32_1 = arith.constant 0 : i32
    %c0_i32_2 = arith.constant 0 : i32
    return %c0_i32, %c0_i32_0, %c0_i32_1 : i32, i32, i32
  }
  func.func @transform_4(%arg0: i32) -> (i32, i32) {
    %c0_i32 = arith.constant 0 : i32
    %c0_i32_0 = arith.constant 0 : i32
    %c0_i32_1 = arith.constant 0 : i32
    return %c0_i32, %c0_i32_0 : i32, i32
  }
  func.func @transform_5(%arg0: i32) -> (i32, i32, i32) {
    %c0_i32 = arith.constant 0 : i32
    %c0_i32_0 = arith.constant 0 : i32
    %c0_i32_1 = arith.constant 0 : i32
    %c0_i32_2 = arith.constant 0 : i32
    return %c0_i32, %c0_i32_0, %c0_i32_1 : i32, i32, i32
  }
  func.func @transform_6(%arg0: i32) -> (i32, i32) {
    %c0_i32 = arith.constant 0 : i32
    %c0_i32_0 = arith.constant 0 : i32
    %c0_i32_1 = arith.constant 0 : i32
    return %c0_i32, %c0_i32_0 : i32, i32
  }
  func.func @transform_7(%arg0: i32) -> (i32, i32) {
    %c0_i32 = arith.constant 0 : i32
    %c0_i32_0 = arith.constant 0 : i32
    %c0_i32_1 = arith.constant 0 : i32
    return %c0_i32, %c0_i32_0 : i32, i32
  }
  func.func @transform_8(%arg0: i32) -> (i32, i32) {
    %c0_i32 = arith.constant 0 : i32
    %c0_i32_0 = arith.constant 0 : i32
    %c0_i32_1 = arith.constant 0 : i32
    return %c0_i32, %c0_i32_0 : i32, i32
  }
  func.func @transform_9(%arg0: i32) -> (i32, i32) {
    %c0_i32 = arith.constant 0 : i32
    %c0_i32_0 = arith.constant 0 : i32
    %c0_i32_1 = arith.constant 0 : i32
    return %c0_i32, %c0_i32_0 : i32, i32
  }
  func.func @transform_10(%arg0: i32) -> (i32, i32) {
    %c0_i32 = arith.constant 0 : i32
    %c0_i32_0 = arith.constant 0 : i32
    return %arg0, %c0_i32 : i32, i32
  }
}

</mosaic_0001>

<bundles_post_ra>
// kernel: tpu_custom_call.1
= control target key start
LH: loop header
LB: loop body
LE: loop exit
PB: predicated region body
PF: predicated region fallthrough
CT: control target
= control target key end

     0   :  { %v1672_v3 = vmov 0.0|0.0   ;;  %vm1673_vm0 = vmmov 0   ;;  %v1674_v6 = vmov 0.0   ;;  %s2085_s0 = inlined_call_operand.vmem [shape: f32[8,64], index: 0, kind: input, shape index: {}]   ;;  %s2086_s1 = inlined_call_operand.vmem [shape: f32[4,64,32], index: 1, kind: input, shape index: {}]   ;;  %s2087_s2 = inlined_call_operand.vmem [shape: f32[4,32], index: 2, kind: input, shape index: {}]   ;;  %s2088_s3 = inlined_call_operand.vmem [shape: f32[4,32,32], index: 3, kind: input, shape index: {}]   ;;  %s2089_s4 = inlined_call_operand.vmem [shape: f32[4,32], index: 4, kind: input, shape index: {}]   ;;  %s2090_s5 = inlined_call_operand.vmem [shape: f32[4,32,64], index: 5, kind: input, shape index: {}]   ;;  %s2091_s6 = inlined_call_operand.vmem [shape: f32[4,64], index: 6, kind: input, shape index: {}]   ;;  %s2092_s7 = inlined_call_operand.vmem [shape: f32[1,64], index: 7, kind: input, shape index: {}]   ;;  %s2093_s8 = inlined_call_operand.vmem [shape: f32[64,32], index: 8, kind: input, shape index: {}]   ;;  %s2094_s9 = inlined_call_operand.<no memory space> [shape: f32[1,1], index: 9, kind: input, shape index: {}]   ;;  %s2095_s10 = inlined_call_operand.hbm [shape: f32[8,128], index: 10, kind: output, shape index: {}]  }
   0x1   :  { %v38_v0 = vld [vmem:[%s2086_s1] sm:$0xff]  ;;  %v39_v1 = vld [vmem:[%s2086_s1 + $0x8] sm:$0xff]  ;;  %v40_v2 = vld [vmem:[%s2086_s1 + $0x10] sm:$0xff]  ;;  %1536 = vmatprep.subr.bf16.mxu0 %v1672_v3  ;;  %1369 = vmatprep.mubr.msk.f32.mxu0 %vm1673_vm0, %v1674_v6 }
   0x2   :  { %v1537_v4 = vpack.c.bf16 %v39_v1, %v38_v0  ;;  %v41_v5 = vld [vmem:[%s2086_s1 + $0x18] sm:$0xff]  ;;  %1548 = vmatprep.subr.bf16.mxu1 %v1672_v3  ;;  %1380 = vmatprep.mubr.msk.f32.mxu1 %vm1673_vm0, %v1674_v6 }
   0x3   :  { %v1540_v7 = vpack.c.bf16 %v41_v5, %v40_v2 }
   0x4   :  { %1538 = vmatpush3.bf16.msra.mxu0 %v1537_v4 }
   0x5   :  { %16 = vsyncpa [#allocation4], 0  ;;  %1539 = vmatprep.subr.bf16.mxu0 %v1672_v3  ;;  %v42_v8 = vld [vmem:[%s2086_s1 + $0x20] sm:$0xff]  ;;  %v43_v9 = vld [vmem:[%s2086_s1 + $0x28] sm:$0xff]  ;;  %vm51_vm1 = vcmask 523264   ;;  %vm136_vm2 = vcmask 261120  }
   0x6   :  { %v1543_v10 = vpack.c.bf16 %v43_v9, %v42_v8  ;;  %v44_v11 = vld [vmem:[%s2086_s1 + $0x30] sm:$0xff]  ;;  %v45_v12 = vld [vmem:[%s2086_s1 + $0x38] sm:$0xff]  ;;  %v1767_v14 = vld [vmem:[%s2085_s0] sm:$0xff] }
   0x7   :  { %v1546_v13 = vpack.c.bf16 %v45_v12, %v44_v11  ;;  %v127_v15 = vld [vmem:[%s2088_s3] sm:$0xff]  ;;  %v128_v16 = vld [vmem:[%s2088_s3 + $0x8] sm:$0xff]  ;;  %v129_v18 = vld [vmem:[%s2088_s3 + $0x10] sm:$0xff] }
   0x8   :  { %1541 = vmatpush3.bf16.msra.mxu0 %v1540_v7  ;;  %v1549_v17 = vpack.c.bf16 %v128_v16, %v127_v15  ;;  %v130_v19 = vld [vmem:[%s2088_s3 + $0x18] sm:$0xff]  ;;  %v1194_v21 = vld [vmem:[%s2087_s2] ss:$0 sm:$0xff]  ;;  %v213_v28 = vld [vmem:[%s2090_s5 + $0x8] sm:$0xff] }
   0x9   :  { %1542 = vmatprep.subr.bf16.mxu0 %v1672_v3  ;;  %v1552_v20 = vpack.c.bf16 %v130_v19, %v129_v18  ;;  %v212_v27 = vld [vmem:[%s2090_s5] sm:$0xff]  ;;  %v214_v30 = vld [vmem:[%s2090_s5 + $0x10] sm:$0xff]  ;;  %v215_v31 = vld [vmem:[%s2090_s5 + $0x18] sm:$0xff] }
   0xa   :  { %1550 = vmatpush3.bf16.msra.mxu1 %v1549_v17  ;;  %v1555_v29 = vpack.c.bf16 %v213_v28, %v212_v27  ;;  %v1558_v32 = vpack.c.bf16 %v215_v31, %v214_v30  ;;  %v1200_v33 = vld [vmem:[%s2086_s1 + $0x40] sm:$0xff]  ;;  %v1201_v34 = vld [vmem:[%s2086_s1 + $0x48] sm:$0xff]  ;;  %v1202_v35 = vld [vmem:[%s2086_s1 + $0x50] sm:$0xff] }
   0xb   :  { %1551 = vmatprep.subr.bf16.mxu1 %v1672_v3  ;;  %v1561_v36 = vpack.c.bf16 %v1201_v34, %v1200_v33  ;;  %v1203_v37 = vld [vmem:[%s2086_s1 + $0x58] sm:$0xff]  ;;  %v1204_v39 = vld [vmem:[%s2086_s1 + $0x60] sm:$0xff]  ;;  %v1205_v40 = vld [vmem:[%s2086_s1 + $0x68] sm:$0xff] }
   0xc   :  { %1544 = vmatpush3.bf16.msra.mxu0 %v1543_v10  ;;  %v1564_v38 = vpack.c.bf16 %v1203_v37, %v1202_v35  ;;  %v1567_v41 = vpack.c.bf16 %v1205_v40, %v1204_v39  ;;  %v1196_v42 = vld [vmem:[%s2089_s4] ss:$0 sm:$0xff]  ;;  %v1206_v48 = vld [vmem:[%s2086_s1 + $0x70] sm:$0xff]  ;;  %v1207_v49 = vld [vmem:[%s2086_s1 + $0x78] sm:$0xff] }
   0xd   :  { %1545 = vmatprep.subr.bf16.mxu0 %v1672_v3  ;;  %v1570_v50 = vpack.c.bf16 %v1207_v49, %v1206_v48  ;;  %v1199_v52 = vld [vmem:[%s2091_s6] ss:$0 sm:$0xff]  ;;  %v1211_v57 = vld [vmem:[%s2088_s3 + $0x28] sm:$0xff]  ;;  %v1212_v59 = vld [vmem:[%s2088_s3 + $0x30] sm:$0xff] }
   0xe   :  { %1553 = vmatpush3.bf16.msra.mxu1 %v1552_v20  ;;  %v1210_v56 = vld [vmem:[%s2088_s3 + $0x20] sm:$0xff]  ;;  %v1213_v60 = vld [vmem:[%s2088_s3 + $0x38] sm:$0xff]  ;;  %v1217_v7 = vld [vmem:[%s2090_s5 + $0x28] sm:$0xff] }
   0xf   :  { %1554 = vmatprep.subr.bf16.mxu1 %v1672_v3  ;;  %v1573_v58 = vpack.c.bf16 %v1211_v57, %v1210_v56  ;;  %v1576_v61 = vpack.c.bf16 %v1213_v60, %v1212_v59  ;;  %v1208_v62 = vld [vmem:[%s2087_s2 + $0x1] ss:$0 sm:$0xff]  ;;  %v1218_v9 = vld [vmem:[%s2090_s5 + $0x30] sm:$0xff]  ;;  %v1219_v10 = vld [vmem:[%s2090_s5 + $0x38] sm:$0xff] }
  0x10   :  { %1547 = vmatpush3.bf16.msra.mxu0 %v1546_v13  ;;  %v1216_v5 = vld [vmem:[%s2090_s5 + $0x20] sm:$0xff]  ;;  %v1582_v11 = vpack.c.bf16 %v1219_v10, %v1218_v9  ;;  %v1223_v13 = vld [vmem:[%s2086_s1 + $0x88] sm:$0xff]  ;;  %v1225_v16 = vld [vmem:[%s2086_s1 + $0x98] sm:$0xff] }
  0x11   :  { %1560 = vmatprep.subr.bf16.mxu0 %v1672_v3  ;;  %v1579_v8 = vpack.c.bf16 %v1217_v7, %v1216_v5  ;;  %v1222_v12 = vld [vmem:[%s2086_s1 + $0x80] sm:$0xff]  ;;  %v1227_v19 = vld [vmem:[%s2086_s1 + $0xa8] sm:$0xff]  ;;  %v1228_v27 = vld [vmem:[%s2086_s1 + $0xb0] sm:$0xff] }
  0x12   :  { %v1585_v15 = vpack.c.bf16 %v1223_v13, %v1222_v12  ;;  %v1226_v18 = vld [vmem:[%s2086_s1 + $0xa0] sm:$0xff]  ;;  %v1229_v28 = vld [vmem:[%s2086_s1 + $0xb8] sm:$0xff]  ;;  %v1239_v48 = vld [vmem:[%s2090_s5 + $0x48] sm:$0xff] }
  0x13   :  { %1370 = vmatmul.mubr.msk.f32.vlgmr.msra.gmra.mrb[0].mxu0 %vm51_vm1, %v1767_v14  ;;  %v1591_v20 = vpack.c.bf16 %v1227_v19, %v1226_v18  ;;  %v1221_v31 = vld [vmem:[%s2091_s6 + $0x1] ss:$0 sm:$0xff]  ;;  %v1235_v39 = vld [vmem:[%s2088_s3 + $0x58] sm:$0xff]  ;;  %v1249_v60 = vld [vmem:[%s2086_s1 + $0xe8] sm:$0xff] }
  0x14   :  { %1410 = vmatprep.mubr.msk.f32.mxu0 %vm1673_vm0, %v1674_v6  ;;  %1562 = vmatpush3.bf16.msra.mxu0 %v1561_v36  ;;  %v1232_v35 = vld [vmem:[%s2088_s3 + $0x40] sm:$0xff]  ;;  %v1233_v36 = vld [vmem:[%s2088_s3 + $0x48] sm:$0xff]  ;;  %v1247_v57 = vld [vmem:[%s2086_s1 + $0xd8] sm:$0xff] }
  0x15   :  { %1563 = vmatprep.subr.bf16.mxu0 %v1672_v3  ;;  %v1597_v37 = vpack.c.bf16 %v1233_v36, %v1232_v35  ;;  %v1248_v59 = vld [vmem:[%s2086_s1 + $0xe0] sm:$0xff]  ;;  %v1250_v5 = vld [vmem:[%s2086_s1 + $0xf0] sm:$0xff]  ;;  %v1251_v7 = vld [vmem:[%s2086_s1 + $0xf8] sm:$0xff] }
  0x16   :  { %v1243_v10 = vld [vmem:[%s2091_s6 + $0x2] ss:$0 sm:$0xff]  ;;  %v1257_v18 = vld [vmem:[%s2088_s3 + $0x78] sm:$0xff] }
  0x17   :  { %v1076_v35 = vld [vmem:[%s2093_s8 + $0x18] sm:$0xff] }
  0x18   :  { %1565 = vmatpush3.bf16.msra.mxu0 %v1564_v38  ;;  %v1234_v38 = vld [vmem:[%s2088_s3 + $0x50] sm:$0xff] }
  0x19   :  { %1566 = vmatprep.subr.bf16.mxu0 %v1672_v3  ;;  %v1600_v40 = vpack.c.bf16 %v1235_v39, %v1234_v38  ;;  %v1078_v38 = vld [vmem:[%s2093_s8 + $0x28] sm:$0xff] }
  0x1c   :  { %1568 = vmatpush3.bf16.msra.mxu0 %v1567_v41  ;;  %v1230_v41 = vld [vmem:[%s2087_s2 + $0x2] ss:$0 sm:$0xff] }
  0x1d   :  { %1569 = vmatprep.subr.bf16.mxu0 %v1672_v3 }
  0x20   :  { %1571 = vmatpush3.bf16.msra.mxu0 %v1570_v50  ;;  %v1240_v50 = vld [vmem:[%s2090_s5 + $0x50] sm:$0xff] }
  0x21   :  { %1584 = vmatprep.subr.bf16.mxu0 %v1672_v3 }
  0xe6   :  { %v121_v22 = vpop.f32.mrb[0].mxu0 }
  0xe7   :  { %v122_v23 = vadd.f32 %v1194_v21, %v121_v22  ;;  %v1371_v24 = vpop.f32.mrb[1].mxu0  ;;  %v1214_v21 = vld [vmem:[%s2089_s4 + $0x1] ss:$0 sm:$0xff] }
  0xe9   :  { %v125_v25 = vmul.f32 0.1, %v122_v23 }
  0xeb   :  { %v126_v26 = vmax.f32 %v122_v23, %v125_v25 }
  0xed   :  { %1381 = vmatmul.mubr.msk.f32.vlgmr.msra.gmra.mrb[0].mxu1 %vm136_vm2, %v126_v26 }
  0xee   :  { %1391 = vmatprep.mubr.msk.f32.mxu1 %vm1673_vm0, %v1674_v6  ;;  %1556 = vmatpush3.bf16.msra.mxu1 %v1555_v29  ;;  %v1594_v29 = vpack.c.bf16 %v1229_v28, %v1228_v27  ;;  %v1261_v27 = vld [vmem:[%s2090_s5 + $0x68] sm:$0xff] }
  0xef   :  { %1557 = vmatprep.subr.bf16.mxu1 %v1672_v3 }
  0xf2   :  { %1559 = vmatpush3.bf16.msra.mxu1 %v1558_v32 }
  0xf3   :  { %1572 = vmatprep.subr.bf16.mxu1 %v1672_v3 }
 0x1c0   :  { %v206_v43 = vpop.f32.mrb[0].mxu1 }
 0x1c1   :  { %v207_v44 = vadd.f32 %v1196_v42, %v206_v43  ;;  %v1382_v45 = vpop.f32.mrb[1].mxu1 }
 0x1c3   :  { %v210_v46 = vmul.f32 0.1, %v207_v44 }
 0x1c5   :  { %v211_v47 = vmax.f32 %v207_v44, %v210_v46 }
 0x1c7   :  { %1392 = vmatmul.mubr.msk.f32.vlgmr.msra.gmra.mrb[2].mxu1 %vm136_vm2, %v211_v47  ;;  %v1238_v47 = vld [vmem:[%s2090_s5 + $0x40] sm:$0xff] }
 0x1c8   :  { %1421 = vmatprep.mubr.msk.f32.mxu1 %vm1673_vm0, %v1674_v6  ;;  %1574 = vmatpush3.bf16.msra.mxu1 %v1573_v58  ;;  %v1603_v49 = vpack.c.bf16 %v1239_v48, %v1238_v47  ;;  %v1080_v47 = vld [vmem:[%s2093_s8 + $0x38] sm:$0xff] }
 0x1c9   :  { %1575 = vmatprep.subr.bf16.mxu1 %v1672_v3 }
 0x1cc   :  { %1577 = vmatpush3.bf16.msra.mxu1 %v1576_v61  ;;  %v1615_v61 = vpack.c.bf16 %v1249_v60, %v1248_v59 }
 0x1cd   :  { %1578 = vmatprep.subr.bf16.mxu1 %v1672_v3 }
 0x29a   :  { %v285_v51 = vpop.f32.mrb[2].mxu1 }
 0x29b   :  { %v289_v53 = vadd.f32 %v285_v51, %v1767_v14  ;;  %v1393_v54 = vpop.f32.mrb[3].mxu1  ;;  %v1224_v14 = vld [vmem:[%s2086_s1 + $0x90] sm:$0xff]  ;;  %v1241_v51 = vld [vmem:[%s2090_s5 + $0x58] sm:$0xff] }
 0x29c   :  { %v1588_v17 = vpack.c.bf16 %v1225_v16, %v1224_v14  ;;  %v1245_v54 = vld [vmem:[%s2086_s1 + $0xc8] sm:$0xff]  ;;  %v1254_v14 = vld [vmem:[%s2088_s3 + $0x60] sm:$0xff] }
 0x29d   :  { %v295_v55 = vadd.f32 %v1199_v52, %v289_v53  ;;  %v1606_v52 = vpack.c.bf16 %v1241_v51, %v1240_v50  ;;  %v1244_v53 = vld [vmem:[%s2086_s1 + $0xc0] sm:$0xff] }
 0x29e   :  { %v1609_v56 = vpack.c.bf16 %v1245_v54, %v1244_v53 }
 0x29f   :  { %1411 = vmatmul.mubr.msk.f32.vlgmr.msra.gmra.mrb[2].mxu0 %vm51_vm1, %v295_v55 }
 0x2a0   :  { %1451 = vmatprep.mubr.msk.f32.mxu0 %vm1673_vm0, %v1674_v6  ;;  %1586 = vmatpush3.bf16.msra.mxu0 %v1585_v15  ;;  %v1255_v15 = vld [vmem:[%s2088_s3 + $0x68] sm:$0xff] }
 0x2a1   :  { %1587 = vmatprep.subr.bf16.mxu0 %v1672_v3  ;;  %v1621_v16 = vpack.c.bf16 %v1255_v15, %v1254_v14 }
 0x2a4   :  { %1589 = vmatpush3.bf16.msra.mxu0 %v1588_v17  ;;  %v1256_v17 = vld [vmem:[%s2088_s3 + $0x70] sm:$0xff] }
 0x2a5   :  { %1590 = vmatprep.subr.bf16.mxu0 %v1672_v3  ;;  %v1624_v19 = vpack.c.bf16 %v1257_v18, %v1256_v17 }
 0x2a8   :  { %1592 = vmatpush3.bf16.msra.mxu0 %v1591_v20  ;;  %v1252_v20 = vld [vmem:[%s2087_s2 + $0x3] ss:$0 sm:$0xff] }
 0x2a9   :  { %1593 = vmatprep.subr.bf16.mxu0 %v1672_v3 }
 0x2ac   :  { %1595 = vmatpush3.bf16.msra.mxu0 %v1594_v29  ;;  %v1262_v29 = vld [vmem:[%s2090_s5 + $0x70] sm:$0xff] }
 0x2ad   :  { %1608 = vmatprep.subr.bf16.mxu0 %v1672_v3 }
 0x372   :  { %v379_v63 = vpop.f32.mrb[2].mxu0 }
 0x373   :  { %v380_v0 = vadd.f32 %v1208_v62, %v379_v63  ;;  %v1412_v1 = vpop.f32.mrb[3].mxu0  ;;  %v1236_v62 = vld [vmem:[%s2089_s4 + $0x2] ss:$0 sm:$0xff] }
 0x375   :  { %v383_v2 = vmul.f32 0.1, %v380_v0 }
 0x377   :  { %v384_v4 = vmax.f32 %v380_v0, %v383_v2 }
 0x379   :  { %1422 = vmatmul.mubr.msk.f32.vlgmr.msra.gmra.mrb[4].mxu1 %vm136_vm2, %v384_v4 }
 0x37a   :  { %1432 = vmatprep.mubr.msk.f32.mxu1 %vm1673_vm0, %v1674_v6  ;;  %1580 = vmatpush3.bf16.msra.mxu1 %v1579_v8  ;;  %v1618_v8 = vpack.c.bf16 %v1251_v7, %v1250_v5 }
 0x37b   :  { %1581 = vmatprep.subr.bf16.mxu1 %v1672_v3 }
 0x37e   :  { %1583 = vmatpush3.bf16.msra.mxu1 %v1582_v11 }
 0x37f   :  { %1596 = vmatprep.subr.bf16.mxu1 %v1672_v3 }
 0x44c   :  { %v464_v22 = vpop.f32.mrb[4].mxu1 }
 0x44d   :  { %v465_v23 = vadd.f32 %v1214_v21, %v464_v22  ;;  %v1423_v24 = vpop.f32.mrb[5].mxu1 }
 0x44f   :  { %v468_v25 = vmul.f32 0.1, %v465_v23 }
 0x451   :  { %v469_v26 = vmax.f32 %v465_v23, %v468_v25 }
 0x453   :  { %1433 = vmatmul.mubr.msk.f32.vlgmr.msra.gmra.mrb[6].mxu1 %vm136_vm2, %v469_v26  ;;  %v1260_v26 = vld [vmem:[%s2090_s5 + $0x60] sm:$0xff] }
 0x454   :  { %1462 = vmatprep.mubr.msk.f32.mxu1 %vm1673_vm0, %v1674_v6  ;;  %1598 = vmatpush3.bf16.msra.mxu1 %v1597_v37  ;;  %v1627_v28 = vpack.c.bf16 %v1261_v27, %v1260_v26  ;;  %v1077_v37 = vld [vmem:[%s2093_s8 + $0x20] sm:$0xff] }
 0x455   :  { %1599 = vmatprep.subr.bf16.mxu1 %v1672_v3  ;;  %v1639_v39 = vpack.c.bf16 %v1078_v38, %v1077_v37 }
 0x458   :  { %1601 = vmatpush3.bf16.msra.mxu1 %v1600_v40  ;;  %v1258_v40 = vld [vmem:[%s2089_s4 + $0x3] ss:$0 sm:$0xff] }
 0x459   :  { %1602 = vmatprep.subr.bf16.mxu1 %v1672_v3 }
 0x526   :  { %v544_v30 = vpop.f32.mrb[6].mxu1 }
 0x527   :  { %v548_v32 = vadd.f32 %v544_v30, %v295_v55  ;;  %v1434_v33 = vpop.f32.mrb[7].mxu1  ;;  %v1246_v55 = vld [vmem:[%s2086_s1 + $0xd0] sm:$0xff] }
 0x528   :  { %v1612_v58 = vpack.c.bf16 %v1247_v57, %v1246_v55  ;;  %v1075_v33 = vld [vmem:[%s2093_s8 + $0x10] sm:$0xff] }
 0x529   :  { %v554_v34 = vadd.f32 %v1221_v31, %v548_v32  ;;  %v1073_v31 = vld [vmem:[%s2093_s8] sm:$0xff]  ;;  %v1074_v32 = vld [vmem:[%s2093_s8 + $0x8] sm:$0xff]  ;;  %v1636_v36 = vpack.c.bf16 %v1076_v35, %v1075_v33 }
 0x52b   :  { %1452 = vmatmul.mubr.msk.f32.vlgmr.msra.gmra.mrb[4].mxu0 %vm51_vm1, %v554_v34 }
 0x52c   :  { %1492 = vmatprep.mubr.msk.f32.mxu0 %vm1673_vm0, %v1674_v6  ;;  %1610 = vmatpush3.bf16.msra.mxu0 %v1609_v56 }
 0x52d   :  { %1611 = vmatprep.subr.bf16.mxu0 %v1672_v3 }
 0x530   :  { %1613 = vmatpush3.bf16.msra.mxu0 %v1612_v58 }
 0x531   :  { %1614 = vmatprep.subr.bf16.mxu0 %v1672_v3 }
 0x534   :  { %1616 = vmatpush3.bf16.msra.mxu0 %v1615_v61  ;;  %v1173_v61 = vlaneseq }
 0x535   :  { %1617 = vmatprep.subr.bf16.mxu0 %v1672_v3 }
 0x538   :  { %1619 = vmatpush3.bf16.msra.mxu0 %v1618_v8 }
 0x539   :  { %1632 = vmatprep.subr.bf16.mxu0 %v1672_v3 }
 0x5fe   :  { %v638_v42 = vpop.f32.mrb[4].mxu0 }
 0x5ff   :  { %v639_v43 = vadd.f32 %v1230_v41, %v638_v42  ;;  %v1453_v44 = vpop.f32.mrb[5].mxu0 }
 0x601   :  { %v642_v45 = vmul.f32 0.1, %v639_v43 }
 0x603   :  { %v643_v46 = vmax.f32 %v639_v43, %v642_v45 }
 0x605   :  { %1463 = vmatmul.mubr.msk.f32.vlgmr.msra.gmra.mrb[8].mxu1 %vm136_vm2, %v643_v46  ;;  %v1079_v46 = vld [vmem:[%s2093_s8 + $0x30] sm:$0xff] }
 0x606   :  { %1473 = vmatprep.mubr.msk.f32.mxu1 %vm1673_vm0, %v1674_v6  ;;  %1604 = vmatpush3.bf16.msra.mxu1 %v1603_v49  ;;  %v1265_v49 = vld [vmem:[%s2091_s6 + $0x3] ss:$0 sm:$0xff] }
 0x607   :  { %1605 = vmatprep.subr.bf16.mxu1 %v1672_v3 }
 0x60a   :  { %1607 = vmatpush3.bf16.msra.mxu1 %v1606_v52  ;;  %v1267_v52 = vld [vmem:[%s2092_s7] ss:$0 sm:$0xff]  ;;  %s1675_s7 = smov [#allocation3]  }
 0x60b   :  { %1620 = vmatprep.subr.bf16.mxu1 %v1672_v3  ;;  %s1186_s2 = sshll.u32 %s1675_s7, 4  ;;  %s1187_s2 = int_to_ptr.vmem [resolvable:$true] %s1186_s2 }
 0x60c   :  { %s1648_s11 = scalar_lea.vmem %s1187_s2, 128  ;;  %p1653_p1 = scmp.lt.s32.totalorder %s1187_s2, %s1187_s2 }
 0x60d   :  { %p1649_p0 = scmp.ne.s32.totalorder %s1187_s2, %s1648_s11  ;;  %p1654_p2 = scmp.lt.s32.totalorder %s1648_s11, %s1648_s11 }
 0x60f   :  { %p1655_p3 = por %p1654_p2, %p1653_p1 }
 0x611   :  { %p1656_p4 = pnand %p1655_p3, %p1649_p0 }
 0x6d8   :  { %v723_v63 = vpop.f32.mrb[8].mxu1 }
 0x6d9   :  { %v724_v0 = vadd.f32 %v1236_v62, %v723_v63  ;;  %v1464_v1 = vpop.f32.mrb[9].mxu1  ;;  %v1174_v62 = vand.u32 127, %v1173_v61 }
 0x6db   :  { %v727_v2 = vmul.f32 0.1, %v724_v0  ;;  %vm1176_vm3 = vcmp.eq.s32.totalorder %v1174_v62, 1  ;;  %vm1175_vm4 = vcmp.eq.s32.totalorder %v1174_v62, 0 }
 0x6dd   :  { %v728_v4 = vmax.f32 %v724_v0, %v727_v2  ;;  %v1171_v0 = vstv %s2094_s9 }
 0x6df   :  { %1474 = vmatmul.mubr.msk.f32.vlgmr.msra.gmra.mrb[10].mxu1 %vm136_vm2, %v728_v4 }
 0x6e0   :  { %1503 = vmatprep.mubr.msk.f32.mxu1 %vm1673_vm0, %v1674_v6  ;;  %1622 = vmatpush3.bf16.msra.mxu1 %v1621_v16 }
 0x6e1   :  { %1623 = vmatprep.subr.bf16.mxu1 %v1672_v3 }
 0x6e4   :  { %1625 = vmatpush3.bf16.msra.mxu1 %v1624_v19 }
 0x6e5   :  { %1626 = vmatprep.subr.bf16.mxu1 %v1672_v3 }
 0x7b2   :  { %v803_v9 = vpop.f32.mrb[10].mxu1 }
 0x7b3   :  { %v807_v11 = vadd.f32 %v803_v9, %v554_v34  ;;  %v1475_v12 = vpop.f32.mrb[11].mxu1  ;;  %v1633_v34 = vpack.c.bf16 %v1074_v32, %v1073_v31 }
 0x7b5   :  { %v813_v13 = vadd.f32 %v1243_v10, %v807_v11 }
 0x7b7   :  { %1493 = vmatmul.mubr.msk.f32.vlgmr.msra.gmra.mrb[6].mxu0 %vm51_vm1, %v813_v13 }
 0x7b8   :  { %1533 = vmatprep.mubr.msk.f32.mxu0 %vm1673_vm0, %v1674_v6  ;;  %1634 = vmatpush3.bf16.msra.mxu0 %v1633_v34 }
 0x7b9   :  { %1635 = vmatprep.subr.bf16.mxu0 %v1672_v3 }
 0x7bc   :  { %1637 = vmatpush3.bf16.msra.mxu0 %v1636_v36 }
 0x7bd   :  { %1638 = vmatprep.subr.bf16.mxu0 %v1672_v3 }
 0x7c0   :  { %1640 = vmatpush3.bf16.msra.mxu0 %v1639_v39 }
 0x7c1   :  { %1641 = vmatprep.subr.bf16.mxu0 %v1672_v3 }
 0x88a   :  { %v897_v21 = vpop.f32.mrb[6].mxu0 }
 0x88b   :  { %v898_v22 = vadd.f32 %v1252_v20, %v897_v21  ;;  %v1494_v23 = vpop.f32.mrb[7].mxu0 }
 0x88d   :  { %v901_v24 = vmul.f32 0.1, %v898_v22 }
 0x88f   :  { %v902_v25 = vmax.f32 %v898_v22, %v901_v24 }
 0x891   :  { %1504 = vmatmul.mubr.msk.f32.vlgmr.msra.gmra.mrb[12].mxu1 %vm136_vm2, %v902_v25 }
 0x892   :  { %1514 = vmatprep.mubr.msk.f32.mxu1 %vm1673_vm0, %v1674_v6  ;;  %1628 = vmatpush3.bf16.msra.mxu1 %v1627_v28  ;;  %v1263_v6 = vld [vmem:[%s2090_s5 + $0x78] sm:$0xff] }
 0x893   :  { %1629 = vmatprep.subr.bf16.mxu1 %v1672_v3  ;;  %v1630_v30 = vpack.c.bf16 %v1263_v6, %v1262_v29  ;;  %v1642_v3 = vpack.c.bf16 %v1080_v47, %v1079_v46 }
 0x895   :  { %1643 = vmatpush3.bf16.msra.mxu0 %v1642_v3 }
 0x896   :  { %1631 = vmatpush3.bf16.msra.mxu1 %v1630_v30 }
 0x964   :  { %v982_v41 = vpop.f32.mrb[12].mxu1 }
 0x965   :  { %v983_v42 = vadd.f32 %v1258_v40, %v982_v41  ;;  %v1505_v43 = vpop.f32.mrb[13].mxu1 }
 0x967   :  { %v986_v44 = vmul.f32 0.1, %v983_v42 }
 0x969   :  { %v987_v45 = vmax.f32 %v983_v42, %v986_v44 }
 0x96b   :  { %1515 = vmatmul.mubr.msk.f32.vlgmr.msra.gmra.mrb[14].mxu1 %vm136_vm2, %v987_v45 }
 0xa3e   :  { %v1062_v48 = vpop.f32.mrb[14].mxu1 }
 0xa3f   :  { %v1066_v50 = vadd.f32 %v1062_v48, %v813_v13  ;;  %v1516_v51 = vpop.f32.mrb[15].mxu1 }
 0xa41   :  { %v1072_v53 = vadd.f32 %v1265_v49, %v1066_v50 }
 0xa43   :  { %1534 = vmatmul.mubr.msk.f32.vlgmr.msra.gmra.mrb[8].mxu0 %vm51_vm1, %v1072_v53  ;;  %v1165_v54 = vmul.f32 %v1267_v52, %v1072_v53 }
 0xa45   :  { %v1167_v55 = vmul.f32 %v1165_v54, %v1165_v54 }
 0xa47   :  { %v1168_v56 = vsel %vm51_vm1, %v1167_v55, 0.0 }
 0xa48   :  { %1169 = vadd.xlane.f32.xlu0 %v1168_v56 }
 0xad5   :  { %v1170_v63 = vpop.xlane.xlu0 %1169 }
 0xad6   :  { %v1172_v1 = vsub.f32 %v1171_v0, %v1170_v63 }
 0xb16   :  { %v1150_v57 = vpop.f32.mrb[8].mxu0 }
 0xb17   :  { %v1154_v58 = vmul.f32 %v1150_v57, %v1150_v57  ;;  %v1535_v59 = vpop.f32.mrb[9].mxu0 }
 0xb19   :  { %v1155_v60 = vsel %vm136_vm2, %v1154_v58, 0.0 }
 0xb1a   :  { %1156 = vadd.xlane.f32.xlu0 %v1155_v60 }
 0xba7   :  { %v1157_v2 = vpop.xlane.xlu0 %1156 }
 0xba8   :  { %v1177_v4 = vsel %vm1176_vm3, %v1157_v2, 0.0 }
 0xba9   :  { %v1178_v5 = vsel %vm1175_vm4, %v1172_v1, %v1177_v4 }
 0xbaa   :  { %1179 = vst [vmem:[#allocation3] sm:$0xff] %v1178_v5 }
 0xbab   :  { %1659 = shalt.err (!%p1656_p4)
}
 0xbac   :  { %s1660_s9 = scalar_lea.hbm %s2095_s10, 128 }
 0xbad   :  { %p1661_p5 = scmp.ne.s32.totalorder %s2095_s10, %s1660_s9  ;;  %p1664_p6 = scmp.lt.u32.totalorder %s1660_s9, %s2095_s10 }
 0xbaf   :  { %p1666_p7 = pnand %p1664_p6, %p1661_p5 }
 0xbb1   :  { %1669 = shalt.err (!%p1666_p7)
}
 0xbb2   :  { %1189 = dma.vmem_to_hbm [thread:$0]  %s1187_s2, 128, %s2095_s10, [#allocation4]  }
 0xbb3   :  { %1670 = dma.done.wait [#allocation4], 128  }
 0xbb4   :  { %1671 = vsyncadd [#allocation4], 4294967168 }
 0xbb5   :  { %1193 = vsyncpa [#allocation4], 1 }

</bundles_post_ra>
